<compile_context>
chip_gen: v7x
topology: tpu7x:2x2x1
jax: 0.10.0
libtpu: 0.0.40
codegen_flags: <defaults>
</compile_context>

<pallas_src>
import jax
import jax.numpy as jnp
from jax.experimental import pallas as pl
from jax.experimental.pallas import tpu as pltpu


def _round_up(x, m):
    return ((x + m - 1) // m) * m


# ---------------------------------------------------------------------------
# Kernels
# ---------------------------------------------------------------------------
def _resident_weight_kernel(x_ref, w_ref, o_ref):
    # x_ref: (tm, Kp) compute_dtype; w_ref: (Kp, Np) resident; o_ref: (tm, Np) f32
    o_ref[...] = jnp.dot(
        x_ref[...], w_ref[...], preferred_element_type=jnp.float32
    ).astype(o_ref.dtype)


def _tiled_matmul_kernel(x_ref, w_ref, o_ref):
    # Grid (M//tm, N//tn, K//tk), reduction axis last.  o_ref's block index (i,j)
    # is independent of k, so it is VMEM-resident across K: accumulate directly.
    @pl.when(pl.program_id(2) == 0)
    def _init():
        o_ref[...] = jnp.zeros_like(o_ref)

    o_ref[...] += jnp.dot(x_ref[...], w_ref[...], preferred_element_type=jnp.float32)


# ---------------------------------------------------------------------------
# Parameter setup (done once, outside the forward hot path)
# ---------------------------------------------------------------------------
def make_circulant_weight(key, input_dim, emb_dim):
    """Reproduce EquivariantEmbedding.__init__: weight (emb_dim, input_dim),
    column 0 ~ N(0,1), column i = torch.roll(column 0, i, dims=0)."""
    emb_column = jax.random.normal(key, (emb_dim,), dtype=jnp.float32)
    rows = jnp.arange(emb_dim)[:, None]
    cols = jnp.arange(input_dim)[None, :]
    # torch.roll(c, i, 0)[r] == c[(r - i) % emb_dim]
    return emb_column[(rows - cols) % emb_dim]


def prepare_weight(weight, *, compute_dtype=jnp.bfloat16):
    """Pad / transpose / cast the (emb_dim, input_dim) weight ONCE at setup.

    Returns (w_prepared, emb_dim): w_prepared is [Kp, Np] = padded weight.T in
    compute_dtype with Kp, Np multiples of 128 (lane-dense output, exact zero
    padding along the contraction dim)."""
    emb_dim, input_dim = weight.shape
    Kp = _round_up(input_dim, 128)
    Np = _round_up(emb_dim, 128)
    w_t = weight.T.astype(compute_dtype)
    if (Kp, Np) == (input_dim, emb_dim):
        return w_t, emb_dim
    wp = jnp.zeros((Kp, Np), compute_dtype).at[:input_dim, :emb_dim].set(w_t)
    return wp, emb_dim


# ---------------------------------------------------------------------------
# Forward
# ---------------------------------------------------------------------------
def equivariant_embedding_forward(
    x,
    w_prepared,
    emb_dim,
    *,
    tm=512,
    tn=512,
    tk=512,
    compute_dtype=jnp.bfloat16,
    vmem_budget_bytes=24 * 1024 * 1024,
):
    """out = x @ weight.T using the pre-padded weight from prepare_weight().

    x: [B, input_dim] f32.  Returns [B, emb_dim] f32.
    NOTE: MXU inputs are bf16 with f32 accumulation (rel err vs f32 ~1e-2);
    pass compute_dtype=jnp.float32 (and a f32-prepared weight) for closer parity.
    """
    B, K = x.shape
    Kp, Np = w_prepared.shape
    assert K <= Kp and emb_dim <= Np
    assert w_prepared.dtype == jnp.dtype(compute_dtype)

    iw = jnp.dtype(compute_dtype).itemsize
    row_align = 16 if iw == 2 else 8  # bf16 packs 16 rows per sublane group

    # ---- batch tile ---------------------------------------------------------
    tm = min(tm, _round_up(B, row_align))
    # v7x megacore: keep >= 2 M tiles when the batch allows it so the "parallel"
    # M axis shards across both TensorCores (harmless on single-TC v5e/v6e).
    if _round_up(B, tm) // tm < 2 and B >= 2 * row_align:
        tm = _round_up(-(-B // 2), row_align)

    # ---- fast path: whole weight VMEM-resident ------------------------------
    weight_vmem = 2 * Kp * Np * iw  # conservative: assume double-buffered
    use_resident = weight_vmem <= vmem_budget_bytes // 2

    if use_resident:
        def footprint(t):
            return weight_vmem + 2 * t * Kp * iw + 2 * t * Np * 4

        while tm > row_align and footprint(tm) > vmem_budget_bytes:
            tm = _round_up(max(row_align, tm // 2), row_align)

        Mp = _round_up(B, tm)
        x_c = x.astype(compute_dtype)
        if (Mp, Kp) != (B, K):
            xp = jnp.zeros((Mp, Kp), compute_dtype).at[:B, :K].set(x_c)
        else:
            xp = x_c  # no pad copy when already aligned

        cost = pl.CostEstimate(
            flops=2 * Mp * Kp * Np,
            transcendentals=0,
            bytes_accessed=Mp * Kp * iw + Kp * Np * iw + Mp * Np * 4,
        )
        out_padded = pl.pallas_call(
            _resident_weight_kernel,
            out_shape=jax.ShapeDtypeStruct((Mp, Np), jnp.float32),
            grid_spec=pltpu.PrefetchScalarGridSpec(
                num_scalar_prefetch=0,
                grid=(Mp // tm,),
                in_specs=[
                    pl.BlockSpec((tm, Kp), lambda i: (i, 0)),
                    pl.BlockSpec((Kp, Np), lambda i: (0, 0)),  # weight: fetched once
                ],
                out_specs=pl.BlockSpec((tm, Np), lambda i: (i, 0)),
            ),
            compiler_params=pltpu.CompilerParams(
                dimension_semantics=("parallel",),
                vmem_limit_bytes=int(min(footprint(tm) + (4 << 20), 48 << 20)),
            ),
            cost_estimate=cost,
        )(xp, w_prepared)
        return out_padded[:B, :emb_dim]

    # ---- fallback: classic (M, N, K) tiled matmul ---------------------------
    tn = min(tn, _round_up(emb_dim, 128))
    tk = min(tk, _round_up(K, 128))
    Mp = _round_up(B, tm)
    Np_t = _round_up(Np, tn)
    Kp_t = _round_up(Kp, tk)

    x_c = x.astype(compute_dtype)
    if (Mp, Kp_t) != (B, K):
        xp = jnp.zeros((Mp, Kp_t), compute_dtype).at[:B, :K].set(x_c)
    else:
        xp = x_c
    if (Kp_t, Np_t) != (Kp, Np):
        wp = jnp.zeros((Kp_t, Np_t), compute_dtype).at[:Kp, :Np].set(w_prepared)
    else:
        wp = w_prepared

    grid = (Mp // tm, Np_t // tn, Kp_t // tk)
    cost = pl.CostEstimate(
        flops=2 * Mp * Kp_t * Np_t,
        transcendentals=0,
        bytes_accessed=(
            grid[1] * Mp * Kp_t * iw      # x re-read once per N tile
            + grid[0] * Kp_t * Np_t * iw  # weight re-read once per M tile
            + Mp * Np_t * 4
        ),
    )
    out_padded = pl.pallas_call(
        _tiled_matmul_kernel,
        out_shape=jax.ShapeDtypeStruct((Mp, Np_t), jnp.float32),
        grid_spec=pltpu.PrefetchScalarGridSpec(
            num_scalar_prefetch=0,
            grid=grid,
            in_specs=[
                pl.BlockSpec((tm, tk), lambda i, j, k: (i, k)),
                pl.BlockSpec((tk, tn), lambda i, j, k: (k, j)),
            ],
            out_specs=pl.BlockSpec((tm, tn), lambda i, j, k: (i, j)),
        ),
        compiler_params=pltpu.CompilerParams(
            dimension_semantics=("parallel", "parallel", "arbitrary"),
            vmem_limit_bytes=int(
                min(2 * (tm * tk + tk * tn) * iw + 2 * tm * tn * 4 + (4 << 20), 48 << 20)
            ),
        ),
        cost_estimate=cost,
    )(xp, wp)
    return out_padded[:B, :emb_dim]


# ---------------------------------------------------------------------------
if __name__ == "__main__":
    key = jax.random.PRNGKey(0)
    k_w, k_x = jax.random.split(key)

    batch = 16
    input_dim = 16
    emb_dim = 32

    weight = make_circulant_weight(k_w, input_dim, emb_dim)  # (emb_dim, input_dim)
    w_prepared, _ = prepare_weight(weight)                   # cached once at setup

    x = jax.random.normal(k_x, (batch, input_dim), dtype=jnp.float32)

    out = equivariant_embedding_forward(x, w_prepared, emb_dim)
    out = jax.block_until_ready(out)

    # Reference: nn.Linear without bias -> x @ weight.T (f32).
    ref = x @ weight.T
    assert out.shape == (batch, emb_dim)

    # bf16 MXU inputs with f32 accumulation: relaxed tolerance vs f32 reference.
    max_abs_err = jnp.max(jnp.abs(out - ref))
    scale = jnp.max(jnp.abs(ref))
    assert max_abs_err / scale < 2e-2, f"mismatch vs reference: rel err {max_abs_err / scale}"

    print("KERNEL_OK")
</pallas_src>

<mosaic_0001>
module attributes {stable_mosaic.version = 11 : i64} {
  func.func @_resident_weight_kernel(%arg0: i32, %arg1: memref<16x128xbf16, #tpu.memory_space<vmem>>, %arg2: memref<128x128xbf16, #tpu.memory_space<vmem>>, %arg3: memref<16x128xf32, #tpu.memory_space<vmem>>) attributes {dimension_semantics = [#tpu.dimension_semantics<parallel>], iteration_bounds = array<i64: 1>, scalar_prefetch = 0 : i64, scratch_operands = 0 : i64, tpu.core_type = #tpu.core_type<tc>, window_params = [{transform_indices = @transform_0, window_bounds = array<i64: 16, 128>}, {pipeline_mode = #tpu.pipeline_mode<synchronous>, transform_indices = @transform_1, window_bounds = array<i64: 128, 128>}, {transform_indices = @transform_2, window_bounds = array<i64: 16, 128>}]} {
    %c0 = arith.constant 0 : index
    %c0_0 = arith.constant 0 : index
    %0 = vector.load %arg1[%c0, %c0_0] : memref<16x128xbf16, #tpu.memory_space<vmem>>, vector<16x128xbf16>
    %c0_1 = arith.constant 0 : index
    %c0_2 = arith.constant 0 : index
    %1 = vector.load %arg2[%c0_1, %c0_2] : memref<128x128xbf16, #tpu.memory_space<vmem>>, vector<128x128xbf16>
    %cst = arith.constant dense<0.000000e+00> : vector<16x128xf32>
    %2 = tpu.matmul %0, %1, %cst {dimension_numbers = #tpu.dot_dimension_numbers<[1], [0], [0], [1], [0, 0, 1, 1], [], []>} : vector<16x128xbf16>, vector<128x128xbf16>, vector<16x128xf32> -> vector<16x128xf32>
    %c0_3 = arith.constant 0 : index
    %c0_4 = arith.constant 0 : index
    %3 = vector.load %arg3[%c0_3, %c0_4] : memref<16x128xf32, #tpu.memory_space<vmem>>, vector<16x128xf32>
    tpu.vector_store %arg3[%c0_3, %c0_4], %2 {strides = array<i32>} : memref<16x128xf32, #tpu.memory_space<vmem>>, vector<16x128xf32>,
    return
  }
  func.func @transform_0(%arg0: i32) -> (i32, i32) {
    %c0_i32 = arith.constant 0 : i32
    %c0_i32_0 = arith.constant 0 : i32
    return %arg0, %c0_i32 : i32, i32
  }
  func.func @transform_1(%arg0: i32) -> (i32, i32) {
    %c0_i32 = arith.constant 0 : i32
    %c0_i32_0 = arith.constant 0 : i32
    %c0_i32_1 = arith.constant 0 : i32
    return %c0_i32, %c0_i32_0 : i32, i32
  }
  func.func @transform_2(%arg0: i32) -> (i32, i32) {
    %c0_i32 = arith.constant 0 : i32
    %c0_i32_0 = arith.constant 0 : i32
    return %arg0, %c0_i32 : i32, i32
  }
}

</mosaic_0001>

<bundles_post_ra>
// kernel: tpu_custom_call.1
= control target key start
LH: loop header
LB: loop body
LE: loop exit
PB: predicated region body
PF: predicated region fallthrough
CT: control target
= control target key end

     0   :  { %7 = vsyncpa [#allocation3], 0  ;;  %s362_s0 = inlined_call_operand.hbm [shape: bf16[16,128], index: 0, kind: input, shape index: {}]   ;;  %s363_s1 = inlined_call_operand.hbm [shape: bf16[128,128], index: 1, kind: input, shape index: {}]   ;;  %s364_s2 = inlined_call_operand.hbm [shape: f32[16,128], index: 2, kind: output, shape index: {}]  }
   0x1   :  { %8 = vsyncpa [#allocation6], 0 }
   0x2   :  { %9 = vsyncpa [#allocation4], 0  ;;  %s302_s9 = smov [#allocation2]   ;;  %s230_s13 = scalar_lea.hbm %s362_s0, 128 }
   0x3   :  { %s15_s10 = sshll.u32 %s302_s9, 4  ;;  %p231_p0 = scmp.ne.s32.totalorder %s362_s0, %s230_s13  ;;  %s16_s10 = int_to_ptr.vmem [resolvable:$true] %s15_s10 }
   0x4   :  { %p234_p1 = scmp.lt.u32.totalorder %s230_s13, %s362_s0 }
   0x6   :  { %p236_p2 = pnand %p234_p1, %p231_p0 }
   0x8   :  { %239 = shalt.err (!%p236_p2)
}
   0x9   :  { %s240_s18 = scalar_lea.vmem %s16_s10, 128  ;;  %p245_p4 = scmp.lt.s32.totalorder %s16_s10, %s16_s10 }
   0xa   :  { %p241_p3 = scmp.ne.s32.totalorder %s16_s10, %s240_s18  ;;  %p246_p5 = scmp.lt.s32.totalorder %s240_s18, %s240_s18 }
   0xc   :  { %p247_p6 = por %p246_p5, %p245_p4 }
   0xe   :  { %p248_p7 = pnand %p247_p6, %p241_p3 }
  0x10   :  { %251 = shalt.err (!%p248_p7)
}
  0x11   :  { %s303_s19 = smov 64   ;;  %s304_s20 = smov 4  }
  0x12   :  { %21 = dma.hbm_to_vmem [thread:$0]  %s362_s0, 128, %s16_s10, [#allocation3], %s303_s19, %s303_s19, %s304_s20  }
  0x13   :  { %s305_s23 = smov [#allocation5]   ;;  %s252_s27 = scalar_lea.hbm %s363_s1, 1024 }
  0x14   :  { %s27_s24 = sshll.u32 %s305_s23, 4  ;;  %p253_p8 = scmp.ne.s32.totalorder %s363_s1, %s252_s27  ;;  %s28_s24 = int_to_ptr.vmem [resolvable:$true] %s27_s24 }
  0x15   :  { %p256_p9 = scmp.lt.u32.totalorder %s252_s27, %s363_s1 }
  0x17   :  { %p258_p10 = pnand %p256_p9, %p253_p8 }
  0x19   :  { %261 = shalt.err (!%p258_p10)
}
  0x1a   :  { %s262_s4 = scalar_lea.vmem %s28_s24, 1024  ;;  %p267_p12 = scmp.lt.s32.totalorder %s28_s24, %s28_s24 }
  0x1b   :  { %p263_p11 = scmp.ne.s32.totalorder %s28_s24, %s262_s4  ;;  %p268_p13 = scmp.lt.s32.totalorder %s262_s4, %s262_s4 }
  0x1d   :  { %p269_p0 = por %p268_p13, %p267_p12 }
  0x1f   :  { %p270_p1 = pnand %p269_p0, %p263_p11 }
  0x21   :  { %273 = shalt.err (!%p270_p1)
}
  0x22   :  { %33 = dma.hbm_to_vmem [thread:$0]  %s363_s1, 1024, %s28_s24, [#allocation6], %s303_s19, %s303_s19, %s304_s20  }
  0x23   :  { %296 = dma.done.wait [#allocation3], 128  }
  0x24   :  { %297 = vsyncadd [#allocation3], 4294967168 }
  0x25   :  { %298 = dma.done.wait [#allocation6], 1024  }
  0x26   :  { %299 = vsyncadd [#allocation6], 4294966272  ;;  %v306_v0 = vmov 0.0   ;;  %vm307_vm0 = vmmov 0   ;;  %v221_v1 = vld [vmem:[#allocation5] sm:$0xff]   ;;  %v222_v2 = vld [vmem:[#allocation5 + $0x8] sm:$0xff]  }
  0x27   :  { %192 = vmatprep.subr.bf16.mxu0 %v306_v0  ;;  %208 = vmatprep.mubr.msk.bf16.mxu0 %vm307_vm0, %v306_v0  ;;  %v223_v3 = vld [vmem:[#allocation5 + $0x10] sm:$0xff]   ;;  %v224_v4 = vld [vmem:[#allocation5 + $0x18] sm:$0xff]   ;;  %v225_v5 = vld [vmem:[#allocation5 + $0x20] sm:$0xff]   ;;  %s308_s1 = smov [#allocation7]  }
  0x28   :  { %193 = vmatpush3.bf16.msra.mxu0 %v221_v1  ;;  %v226_v6 = vld [vmem:[#allocation5 + $0x28] sm:$0xff]   ;;  %v227_v7 = vld [vmem:[#allocation5 + $0x30] sm:$0xff]   ;;  %v228_v8 = vld [vmem:[#allocation5 + $0x38] sm:$0xff]   ;;  %s161_s6 = sshll.u32 %s308_s1, 4  ;;  %s162_s6 = int_to_ptr.vmem [resolvable:$true] %s161_s6 }
  0x29   :  { %194 = vmatprep.subr.bf16.mxu0 %v306_v0  ;;  %v229_v9 = vld [vmem:[#allocation2] sm:$0xff]   ;;  %s274_s7 = scalar_lea.vmem %s162_s6, 256  ;;  %p279_p3 = scmp.lt.s32.totalorder %s162_s6, %s162_s6 }
  0x2a   :  { %p275_p2 = scmp.ne.s32.totalorder %s162_s6, %s274_s7  ;;  %p280_p4 = scmp.lt.s32.totalorder %s274_s7, %s274_s7 }
  0x2c   :  { %195 = vmatpush3.bf16.msra.mxu0 %v222_v2  ;;  %p281_p5 = por %p280_p4, %p279_p3 }
  0x2d   :  { %196 = vmatprep.subr.bf16.mxu0 %v306_v0 }
  0x2e   :  { %p282_p6 = pnand %p281_p5, %p275_p2 }
  0x30   :  { %197 = vmatpush3.bf16.msra.mxu0 %v223_v3 }
  0x31   :  { %198 = vmatprep.subr.bf16.mxu0 %v306_v0 }
  0x34   :  { %199 = vmatpush3.bf16.msra.mxu0 %v224_v4 }
  0x35   :  { %200 = vmatprep.subr.bf16.mxu0 %v306_v0 }
  0x38   :  { %201 = vmatpush3.bf16.msra.mxu0 %v225_v5 }
  0x39   :  { %202 = vmatprep.subr.bf16.mxu0 %v306_v0 }
  0x3c   :  { %203 = vmatpush3.bf16.msra.mxu0 %v226_v6 }
  0x3d   :  { %204 = vmatprep.subr.bf16.mxu0 %v306_v0 }
  0x40   :  { %205 = vmatpush3.bf16.msra.mxu0 %v227_v7 }
  0x41   :  { %206 = vmatprep.subr.bf16.mxu0 %v306_v0 }
  0x44   :  { %207 = vmatpush3.bf16.msra.mxu0 %v228_v8 }
  0x47   :  { %209 = vmatmul.mubr.bf16.vlgmr.msra.gmra.mrb[0].mxu0 %v229_v9 }
 0x11a   :  { %v147_v10 = vpop.f32.mrb[0].mxu0 }
 0x11b   :  { %154 = vst [vmem:[#allocation7] sm:$0xff] %v147_v10  ;;  %v210_v11 = vpop.f32.mrb[1].mxu0 }
 0x11c   :  { %v150_v12 = vpop.f32.mrb[2].mxu0 }
 0x11d   :  { %155 = vst [vmem:[#allocation7 + $0x8] sm:$0xff] %v150_v12  ;;  %v211_v13 = vpop.f32.mrb[3].mxu0 }
 0x11e   :  { %285 = shalt.err (!%p282_p6)
}
 0x11f   :  { %s286_s10 = scalar_lea.hbm %s364_s2, 256 }
 0x120   :  { %p287_p7 = scmp.ne.s32.totalorder %s364_s2, %s286_s10  ;;  %p290_p8 = scmp.lt.u32.totalorder %s286_s10, %s364_s2 }
 0x122   :  { %p292_p9 = pnand %p290_p8, %p287_p7 }
 0x124   :  { %295 = shalt.err (!%p292_p9)
}
 0x125   :  { %s309_s15 = smov 128   ;;  %s310_s16 = smov 8  }
 0x126   :  { %167 = dma.vmem_to_hbm [thread:$0]  %s162_s6, 256, %s364_s2, [#allocation4], %s309_s15, %s309_s15, %s310_s16  }
 0x127   :  { %300 = dma.done.wait [#allocation4], 256  }
 0x128   :  { %301 = vsyncadd [#allocation4], 4294967040 }
 0x129   :  { %171 = vsyncpa [#allocation3], 1 }
 0x12a   :  { %172 = vsyncpa [#allocation6], 1 }
 0x12b   :  { %173 = vsyncpa [#allocation4], 1 }

</bundles_post_ra>
